<compile_context>
chip_gen: v5e
topology: v5e:2x2
jax: 0.10.0
libtpu: 0.0.40
codegen_flags: <defaults>
</compile_context>

<pallas_src>
import math

import jax
import jax.numpy as jnp
import numpy as np
from jax.experimental import pallas as pl
from jax.experimental.pallas import tpu as pltpu


# ---------------------------------------------------------------------------
# Kernel
# ---------------------------------------------------------------------------
def _inorm3(y, gamma, beta, eps=1e-5):
    # y: (Bt, N, Dp); InstanceNorm1d over the sequence axis N per (batch, chan).
    # Two-pass variance (matches torch / the reference; avoids cancellation).
    mu = jnp.mean(y, axis=1, keepdims=True)
    yc = y - mu
    var = jnp.mean(yc * yc, axis=1, keepdims=True)
    return yc * jax.lax.rsqrt(var + eps) * gamma + beta


def kp_encoder_kernel(
    coef_ref,                    # SMEM (L,)  log_scale * AFT_dist_alpha per layer
    data_ref,                    # (Bt, N, 2)          f32
    dist_ref,                    # (Bt, N, N)          f32 (negative distances)
    emb_wt_ref, emb_b_ref,       # (2, Dp), (1, Dp)    f32
    wqkv_ref,                    # (1, Dp, 3Dp)        mxu dtype  [Wq^T|Wk^T|Wv^T]
    g1_ref, bn1_ref,             # (1, 1, Dp)          f32
    w1_ref, bf1_ref,             # (1, Dp, Fp), (1,1,Fp)
    w2_ref, bf2_ref,             # (1, Fp, Dp), (1,1,Dp)
    g2_ref, bn2_ref,             # (1, 1, Dp)
    out_ref,                     # (Bt, N, Dp)         f32
    x_ref,                       # VMEM scratch (Bt, N, Dp) f32 -- layer carry
):
    l = pl.program_id(1)
    num_layers = pl.num_programs(1)
    Bt, N, Dp = x_ref.shape
    mxu_dtype = wqkv_ref.dtype

    # --- Embedding (only at the first layer step of each batch tile) --------
    @pl.when(l == 0)
    def _():
        d = data_ref[...]                                      # (Bt, N, 2)
        x_ref[...] = (d[:, :, 0:1] * emb_wt_ref[0:1, :]
                      + d[:, :, 1:2] * emb_wt_ref[1:2, :]
                      + emb_b_ref[...])                        # (Bt, N, Dp)

    coef = coef_ref[l]                                         # SMEM scalar

    x = x_ref[...]                                             # (Bt, N, Dp) f32
    x2 = x.reshape(Bt * N, Dp)

    # Fused q/k/v projection: one (Bt*N, Dp) @ (Dp, 3Dp) bf16 MXU matmul,
    # f32 accumulation.  Dp is a multiple of 128 so the slices are lane-aligned.
    qkv = jnp.dot(x2.astype(mxu_dtype), wqkv_ref[0],
                  preferred_element_type=jnp.float32)
    q = qkv[:, :Dp]
    k = qkv[:, Dp:2 * Dp]
    v = qkv[:, 2 * Dp:]
    sig_q = jax.nn.sigmoid(q)
    ek = jnp.exp(k)                                            # f32

    # AFT attention with distance bias.  Two einsums sharing the exp(coef*dist)
    # operand (no lane-axis concat / unaligned slicing).
    # TODO(synk): per-layer alphas are independent learnable params, so the
    # (N,N) exp cannot be hoisted across layers without changing semantics.
    a = jnp.exp(coef * dist_ref[...]).astype(mxu_dtype)        # (Bt, N, N)
    ekv = (ek * v).reshape(Bt, N, Dp).astype(mxu_dtype)
    ekm = ek.reshape(Bt, N, Dp).astype(mxu_dtype)
    bias = jnp.einsum("bnm,bmd->bnd", a, ekv,
                      preferred_element_type=jnp.float32).reshape(Bt * N, Dp)
    denom = jnp.einsum("bnm,bmd->bnd", a, ekm,
                       preferred_element_type=jnp.float32).reshape(Bt * N, Dp)

    weighted = bias * pl.reciprocal(denom, approx=False)
    # TODO(synk): torch branches on isnan(weighted).any() and then applies
    # nan_to_num_ (which also maps +/-Inf) to the whole tensors; here NaNs are
    # zeroed elementwise (identical whenever no NaN occurs, the normal case).
    weighted = jnp.where(jnp.isnan(weighted), 0.0, weighted)
    attn_out = sig_q * weighted

    # Add & InstanceNorm 1
    h1 = _inorm3((x2 + attn_out).reshape(Bt, N, Dp), g1_ref[0], bn1_ref[0])
    h1_2 = h1.reshape(Bt * N, Dp)

    # Feed forward (rows folded to Bt*N; bf16 operands, f32 accumulate)
    hidden = jnp.maximum(
        jnp.dot(h1_2.astype(mxu_dtype), w1_ref[0],
                preferred_element_type=jnp.float32) + bf1_ref[0],
        0.0,
    )
    ff = (jnp.dot(hidden.astype(mxu_dtype), w2_ref[0],
                  preferred_element_type=jnp.float32) + bf2_ref[0])

    # Add & InstanceNorm 2 -> layer carry
    x_new = _inorm3((h1_2 + ff).reshape(Bt, N, Dp), g2_ref[0], bn2_ref[0])
    x_ref[...] = x_new

    @pl.when(l == num_layers - 1)
    def _():
        out_ref[...] = x_new


# ---------------------------------------------------------------------------
# Wrapper
# ---------------------------------------------------------------------------
def _round_up(x, m):
    return ((x + m - 1) // m) * m


def _pad_to(x, shape):
    pads = [(0, t - s) for s, t in zip(x.shape, shape)]
    return jnp.pad(x, pads)


def _pick_bt(B, N, Dp, Fp, vmem_bytes):
    """VMEM-budget-aware batch tile; keeps >=2 batch grid steps when possible."""
    # Per-layer weights (bf16, double-buffered) + small f32 params (2 buffers).
    weight_bytes = 2 * 2 * (3 * Dp * Dp + 2 * Dp * Fp) + 2 * 4 * (6 * Dp + 2 * Fp)
    # Per-batch-element cost: dist block (2 buffers) + exp(coef*dist) temp,
    # ~12 (N,Dp)-sized f32 temporaries (carry, qkv, attn, norms, out buffers),
    # FF hidden, data block.
    per_b = (3 * N * N + 12 * N * Dp + 2 * N * Fp + 2 * N * 2) * 4
    budget = int(vmem_bytes * 0.6) - weight_bytes
    bt = max(1, budget // max(per_b, 1))
    bt = int(min(bt, B))
    if B > 1:
        bt = min(bt, max(1, B // 2))     # >=2 batch steps (megacore / pipelining)
    while bt > 1 and B % bt != 0:        # keep tiles even
        bt -= 1
    return int(bt)


def kp_encoder_forward(data, dist, log_scale, params, bt=None,
                       mxu_dtype=jnp.bfloat16):
    B, N, two = data.shape
    D = params["emb_wt"].shape[1]
    layers = params["layers"]
    L = len(layers)
    F = layers[0]["w1_t"].shape[1]

    # Lane-align the channel dims (padded channels are exact zeros end-to-end).
    Dp = _round_up(max(D, 1), 128)
    Fp = _round_up(max(F, 1), 128)

    emb_wt = _pad_to(params["emb_wt"], (two, Dp))
    emb_b = _pad_to(params["emb_b"], (1, Dp))

    def pad_dd(w):
        return _pad_to(w, (Dp, Dp))

    wqkv = jnp.stack(
        [jnp.concatenate([pad_dd(l["wq_t"]), pad_dd(l["wk_t"]),
                          pad_dd(l["wv_t"])], axis=1)
         for l in layers]).astype(mxu_dtype)                       # (L, Dp, 3Dp)
    g1 = jnp.stack([_pad_to(l["g1"], (1, Dp)) for l in layers])    # (L, 1, Dp)
    bn1 = jnp.stack([_pad_to(l["bn1"], (1, Dp)) for l in layers])
    w1 = jnp.stack([_pad_to(l["w1_t"], (Dp, Fp))
                    for l in layers]).astype(mxu_dtype)            # (L, Dp, Fp)
    bf1 = jnp.stack([_pad_to(l["bf1"], (1, Fp)) for l in layers])
    w2 = jnp.stack([_pad_to(l["w2_t"], (Fp, Dp))
                    for l in layers]).astype(mxu_dtype)            # (L, Fp, Dp)
    bf2 = jnp.stack([_pad_to(l["bf2"], (1, Dp)) for l in layers])
    g2 = jnp.stack([_pad_to(l["g2"], (1, Dp)) for l in layers])
    bn2 = jnp.stack([_pad_to(l["bn2"], (1, Dp)) for l in layers])
    coefs = jnp.stack(
        [(log_scale * l["alpha"]).astype(jnp.float32) for l in layers]
    ).reshape(L)                                                   # (L,)

    # Generation-aware VMEM budget.
    try:
        vmem_cap = int(pltpu.get_tpu_info().vmem_capacity_bytes)
    except Exception:
        vmem_cap = 64 * 2**20
    vmem_limit = min(int(vmem_cap * 7 // 8), 128 * 2**20)

    if bt is None:
        bt = _pick_bt(B, N, Dp, Fp, vmem_limit)
    assert B % bt == 0

    grid = (B // bt, L)

    out = pl.pallas_call(
        kp_encoder_kernel,
        out_shape=jax.ShapeDtypeStruct((B, N, Dp), jnp.float32),
        grid=grid,
        in_specs=[
            pl.BlockSpec(memory_space=pltpu.MemorySpace.SMEM),        # coefs
            pl.BlockSpec((bt, N, two), lambda b, l: (b, 0, 0)),       # data
            pl.BlockSpec((bt, N, N), lambda b, l: (b, 0, 0)),         # dist
            pl.BlockSpec((two, Dp), lambda b, l: (0, 0)),             # emb_wt
            pl.BlockSpec((1, Dp), lambda b, l: (0, 0)),               # emb_b
            pl.BlockSpec((1, Dp, 3 * Dp), lambda b, l: (l, 0, 0)),    # wqkv
            pl.BlockSpec((1, 1, Dp), lambda b, l: (l, 0, 0)),         # g1
            pl.BlockSpec((1, 1, Dp), lambda b, l: (l, 0, 0)),         # bn1
            pl.BlockSpec((1, Dp, Fp), lambda b, l: (l, 0, 0)),        # w1
            pl.BlockSpec((1, 1, Fp), lambda b, l: (l, 0, 0)),         # bf1
            pl.BlockSpec((1, Fp, Dp), lambda b, l: (l, 0, 0)),        # w2
            pl.BlockSpec((1, 1, Dp), lambda b, l: (l, 0, 0)),         # bf2
            pl.BlockSpec((1, 1, Dp), lambda b, l: (l, 0, 0)),         # g2
            pl.BlockSpec((1, 1, Dp), lambda b, l: (l, 0, 0)),         # bn2
        ],
        out_specs=pl.BlockSpec((bt, N, Dp), lambda b, l: (b, 0, 0)),
        scratch_shapes=[pltpu.VMEM((bt, N, Dp), jnp.float32)],
        compiler_params=pltpu.CompilerParams(
            dimension_semantics=("parallel", "arbitrary"),
            vmem_limit_bytes=vmem_limit),
    )(coefs, data, dist, emb_wt, emb_b,
      wqkv, g1, bn1, w1, bf1, w2, bf2, g2, bn2)

    return out[:, :, :D]


# ---------------------------------------------------------------------------
# Pure-JAX reference (mirrors the PyTorch forward exactly)
# ---------------------------------------------------------------------------
def _ref_inorm(y, gamma, beta, eps=1e-5):
    mu = jnp.mean(y, axis=1, keepdims=True)
    var = jnp.mean((y - mu) ** 2, axis=1, keepdims=True)
    return (y - mu) * jax.lax.rsqrt(var + eps) * gamma + beta


def kp_encoder_reference(data, dist, log_scale, params):
    out = data @ params["emb_wt"] + params["emb_b"]
    for L in params["layers"]:
        x = out
        q = x @ L["wq_t"]
        k = x @ L["wk_t"]
        v = x @ L["wv_t"]
        a = jnp.exp(log_scale * L["alpha"] * dist)
        ek = jnp.exp(k)
        bias = a @ (ek * v)
        denom = a @ ek
        weighted = bias / denom
        attn_out = jax.nn.sigmoid(q) * weighted
        h1 = _ref_inorm(x + attn_out, L["g1"], L["bn1"])
        ff = jnp.maximum(h1 @ L["w1_t"] + L["bf1"], 0.0) @ L["w2_t"] + L["bf2"]
        out = _ref_inorm(h1 + ff, L["g2"], L["bn2"])
    return out


# ---------------------------------------------------------------------------
# Deterministic parameter init (PyTorch-style uniform(-1/sqrt(fan_in), ...))
# ---------------------------------------------------------------------------
def _linear_init(key, fan_in, fan_out, bias=True):
    kw, kb = jax.random.split(key)
    bound = 1.0 / math.sqrt(fan_in)
    wt = jax.random.uniform(kw, (fan_in, fan_out), jnp.float32, -bound, bound)
    b = (jax.random.uniform(kb, (1, fan_out), jnp.float32, -bound, bound)
         if bias else None)
    return wt, b


def make_params(key, D, F, num_layers, alpha_default):
    keys = jax.random.split(key, 1 + num_layers)
    emb_wt, emb_b = _linear_init(keys[0], 2, D)
    layers = []
    for i in range(num_layers):
        lk = jax.random.split(keys[1 + i], 5)
        wq_t, _ = _linear_init(lk[0], D, D, bias=False)
        wk_t, _ = _linear_init(lk[1], D, D, bias=False)
        wv_t, _ = _linear_init(lk[2], D, D, bias=False)
        w1_t, bf1 = _linear_init(lk[3], D, F)
        w2_t, bf2 = _linear_init(lk[4], F, D)
        layers.append(
            dict(
                wq_t=wq_t, wk_t=wk_t, wv_t=wv_t,
                g1=jnp.ones((1, D), jnp.float32),
                bn1=jnp.zeros((1, D), jnp.float32),
                w1_t=w1_t, bf1=bf1, w2_t=w2_t, bf2=bf2,
                g2=jnp.ones((1, D), jnp.float32),
                bn2=jnp.zeros((1, D), jnp.float32),
                alpha=jnp.float32(alpha_default),
            )
        )
    return dict(emb_wt=emb_wt, emb_b=emb_b, layers=layers)


# ---------------------------------------------------------------------------
if __name__ == "__main__":
    B, N, D, F_DIM = 2, 8, 32, 64
    NUM_LAYERS = 2
    ALPHA_DEFAULT = 0.1
    log_scale = jnp.float32(math.log2(N))

    key = jax.random.PRNGKey(0)
    k_data, k_dist, k_param = jax.random.split(key, 3)

    data = jax.random.uniform(k_data, (B, N, 2), jnp.float32)            # KP items
    dist = -jnp.abs(jax.random.uniform(k_dist, (B, N, N), jnp.float32))  # negative dist

    params = make_params(k_param, D, F_DIM, NUM_LAYERS, ALPHA_DEFAULT)

    ref = kp_encoder_reference(data, dist, log_scale, params)

    # f32 MXU path: tight check against the pure-JAX reference.
    out_f32 = jax.block_until_ready(
        kp_encoder_forward(data, dist, log_scale, params,
                           mxu_dtype=jnp.float32))
    np.testing.assert_allclose(np.asarray(out_f32), np.asarray(ref),
                               rtol=1e-4, atol=1e-4)

    # bf16-MXU path (default / production): looser tolerance for bf16 operands.
    out_bf16 = jax.block_until_ready(
        kp_encoder_forward(data, dist, log_scale, params))
    np.testing.assert_allclose(np.asarray(out_bf16), np.asarray(ref),
                               rtol=5e-2, atol=5e-2)

    print("KERNEL_OK")
</pallas_src>

<mosaic_0001>
module attributes {stable_mosaic.version = 11 : i64} {
  func.func @kp_encoder_kernel(%arg0: i32, %arg1: i32, %arg2: memref<2xf32, #tpu.memory_space<smem>>, %arg3: memref<1x8x2xf32, #tpu.memory_space<vmem>>, %arg4: memref<1x8x8xf32, #tpu.memory_space<vmem>>, %arg5: memref<2x128xf32, #tpu.memory_space<vmem>>, %arg6: memref<1x128xf32, #tpu.memory_space<vmem>>, %arg7: memref<1x128x384xf32, #tpu.memory_space<vmem>>, %arg8: memref<1x1x128xf32, #tpu.memory_space<vmem>>, %arg9: memref<1x1x128xf32, #tpu.memory_space<vmem>>, %arg10: memref<1x128x128xf32, #tpu.memory_space<vmem>>, %arg11: memref<1x1x128xf32, #tpu.memory_space<vmem>>, %arg12: memref<1x128x128xf32, #tpu.memory_space<vmem>>, %arg13: memref<1x1x128xf32, #tpu.memory_space<vmem>>, %arg14: memref<1x1x128xf32, #tpu.memory_space<vmem>>, %arg15: memref<1x1x128xf32, #tpu.memory_space<vmem>>, %arg16: memref<1x8x128xf32, #tpu.memory_space<vmem>>, %arg17: memref<1x8x128xf32, #tpu.memory_space<vmem>>) attributes {dimension_semantics = [#tpu.dimension_semantics<parallel>, #tpu.dimension_semantics<arbitrary>], iteration_bounds = array<i64: 2, 2>, scalar_prefetch = 0 : i64, scratch_operands = 1 : i64, tpu.core_type = #tpu.core_type<tc>, window_params = [{transform_indices = @transform_0, window_bounds = array<i64: 2>}, {transform_indices = @transform_1, window_bounds = array<i64: 1, 8, 2>}, {transform_indices = @transform_2, window_bounds = array<i64: 1, 8, 8>}, {pipeline_mode = #tpu.pipeline_mode<synchronous>, transform_indices = @transform_3, window_bounds = array<i64: 2, 128>}, {pipeline_mode = #tpu.pipeline_mode<synchronous>, transform_indices = @transform_4, window_bounds = array<i64: 1, 128>}, {transform_indices = @transform_5, window_bounds = array<i64: 1, 128, 384>}, {transform_indices = @transform_6, window_bounds = array<i64: 1, 1, 128>}, {transform_indices = @transform_7, window_bounds = array<i64: 1, 1, 128>}, {transform_indices = @transform_8, window_bounds = array<i64: 1, 128, 128>}, {transform_indices = @transform_9, window_bounds = array<i64: 1, 1, 128>}, {transform_indices = @transform_10, window_bounds = array<i64: 1, 128, 128>}, {transform_indices = @transform_11, window_bounds = array<i64: 1, 1, 128>}, {transform_indices = @transform_12, window_bounds = array<i64: 1, 1, 128>}, {transform_indices = @transform_13, window_bounds = array<i64: 1, 1, 128>}, {transform_indices = @transform_14, window_bounds = array<i64: 1, 8, 128>}]} {
    %c0_i32 = arith.constant 0 : i32
    %0 = arith.cmpi eq, %arg1, %c0_i32 : i32
    %1 = arith.extui %0 : i1 to i32
    %c0_i32_0 = arith.constant 0 : i32
    %2 = arith.cmpi ne, %1, %c0_i32_0 : i32
    scf.if %2 {
      %c0_54 = arith.constant 0 : index
      %c0_55 = arith.constant 0 : index
      %c0_56 = arith.constant 0 : index
      %113 = vector.load %arg3[%c0_54, %c0_55, %c0_56] : memref<1x8x2xf32, #tpu.memory_space<vmem>>, vector<1x8x2xf32>
      %114 = vector.extract_strided_slice %113 {offsets = [0, 0, 0], sizes = [1, 8, 1], strides = [1, 1, 1]} : vector<1x8x2xf32> to vector<1x8x1xf32>
      %c0_57 = arith.constant 0 : index
      %c0_58 = arith.constant 0 : index
      %115 = vector.load %arg5[%c0_57, %c0_58] : memref<2x128xf32, #tpu.memory_space<vmem>>, vector<1x128xf32>
      %116 = vector.shape_cast %115 : vector<1x128xf32> to vector<1x1x128xf32>
      %117 = vector.broadcast %114 : vector<1x8x1xf32> to vector<1x8x128xf32>
      %118 = vector.broadcast %116 : vector<1x1x128xf32> to vector<1x8x128xf32>
      %119 = arith.mulf %117, %118 : vector<1x8x128xf32>
      %120 = vector.extract_strided_slice %113 {offsets = [0, 0, 1], sizes = [1, 8, 1], strides = [1, 1, 1]} : vector<1x8x2xf32> to vector<1x8x1xf32>
      %c1 = arith.constant 1 : index
      %c0_59 = arith.constant 0 : index
      %121 = vector.load %arg5[%c1, %c0_59] : memref<2x128xf32, #tpu.memory_space<vmem>>, vector<1x128xf32>
      %122 = vector.shape_cast %121 : vector<1x128xf32> to vector<1x1x128xf32>
      %123 = vector.broadcast %120 : vector<1x8x1xf32> to vector<1x8x128xf32>
      %124 = vector.broadcast %122 : vector<1x1x128xf32> to vector<1x8x128xf32>
      %125 = arith.mulf %123, %124 : vector<1x8x128xf32>
      %126 = arith.addf %119, %125 : vector<1x8x128xf32>
      %c0_60 = arith.constant 0 : index
      %c0_61 = arith.constant 0 : index
      %127 = vector.load %arg6[%c0_60, %c0_61] : memref<1x128xf32, #tpu.memory_space<vmem>>, vector<1x128xf32>
      %128 = vector.shape_cast %127 : vector<1x128xf32> to vector<1x1x128xf32>
      %129 = vector.broadcast %128 : vector<1x1x128xf32> to vector<1x8x128xf32>
      %130 = arith.addf %126, %129 : vector<1x8x128xf32>
      %c0_62 = arith.constant 0 : index
      %c0_63 = arith.constant 0 : index
      %c0_64 = arith.constant 0 : index
      %131 = vector.load %arg17[%c0_62, %c0_63, %c0_64] : memref<1x8x128xf32, #tpu.memory_space<vmem>>, vector<1x8x128xf32>
      tpu.vector_store %arg17[%c0_62, %c0_63, %c0_64], %130 {strides = array<i32>} : memref<1x8x128xf32, #tpu.memory_space<vmem>>, vector<1x8x128xf32>,
    } else {
    }
    %3 = arith.index_cast %arg1 : i32 to index
    %4 = memref.load %arg2[%3] : memref<2xf32, #tpu.memory_space<smem>>
    %c0 = arith.constant 0 : index
    %c0_1 = arith.constant 0 : index
    %c0_2 = arith.constant 0 : index
    %5 = vector.load %arg17[%c0, %c0_1, %c0_2] : memref<1x8x128xf32, #tpu.memory_space<vmem>>, vector<1x8x128xf32>
    %6 = vector.shape_cast %5 : vector<1x8x128xf32> to vector<8x128xf32>
    %c0_3 = arith.constant 0 : index
    %c0_4 = arith.constant 0 : index
    %c0_5 = arith.constant 0 : index
    %7 = vector.load %arg7[%c0_3, %c0_4, %c0_5] : memref<1x128x384xf32, #tpu.memory_space<vmem>>, vector<1x128x384xf32>
    %8 = vector.shape_cast %7 : vector<1x128x384xf32> to vector<128x384xf32>
    %cst = arith.constant dense<0.000000e+00> : vector<8x384xf32>
    %9 = tpu.matmul %6, %8, %cst {dimension_numbers = #tpu.dot_dimension_numbers<[1], [0], [0], [1], [0, 0, 1, 1], [], []>} : vector<8x128xf32>, vector<128x384xf32>, vector<8x384xf32> -> vector<8x384xf32>
    %10 = vector.extract_strided_slice %9 {offsets = [0, 0], sizes = [8, 128], strides = [1, 1]} : vector<8x384xf32> to vector<8x128xf32>
    %11 = vector.extract_strided_slice %9 {offsets = [0, 128], sizes = [8, 128], strides = [1, 1]} : vector<8x384xf32> to vector<8x128xf32>
    %12 = vector.extract_strided_slice %9 {offsets = [0, 256], sizes = [8, 128], strides = [1, 1]} : vector<8x384xf32> to vector<8x128xf32>
    %13 = arith.negf %10 : vector<8x128xf32>
    %14 = math.exp %13 : vector<8x128xf32>
    %cst_6 = arith.constant 1.000000e+00 : f32
    %15 = vector.broadcast %cst_6 : f32 to vector<8x128xf32>
    %16 = arith.addf %15, %14 : vector<8x128xf32>
    %17 = arith.divf %15, %16 : vector<8x128xf32>
    %18 = math.exp %11 : vector<8x128xf32>
    %c0_7 = arith.constant 0 : index
    %c0_8 = arith.constant 0 : index
    %c0_9 = arith.constant 0 : index
    %19 = vector.load %arg4[%c0_7, %c0_8, %c0_9] : memref<1x8x8xf32, #tpu.memory_space<vmem>>, vector<1x8x8xf32>
    %20 = vector.broadcast %4 : f32 to vector<1x8x8xf32>
    %21 = arith.mulf %20, %19 : vector<1x8x8xf32>
    %22 = math.exp %21 : vector<1x8x8xf32>
    %23 = arith.mulf %18, %12 : vector<8x128xf32>
    %24 = vector.shape_cast %23 : vector<8x128xf32> to vector<1x8x128xf32>
    %25 = vector.shape_cast %18 : vector<8x128xf32> to vector<1x8x128xf32>
    "tpu.trace_start"() <{level = 10 : i32, message = "bnm,bmd->bnd"}> : () -> ()
    %cst_10 = arith.constant dense<0.000000e+00> : vector<1x8x128xf32>
    %26 = tpu.matmul %22, %24, %cst_10 {dimension_numbers = #tpu.dot_dimension_numbers<[2], [1], [1], [2], [0, 0, 0, 1, 1, 2], [0], [0]>} : vector<1x8x8xf32>, vector<1x8x128xf32>, vector<1x8x128xf32> -> vector<1x8x128xf32>
    "tpu.trace_stop"() : () -> ()
    %27 = vector.shape_cast %26 : vector<1x8x128xf32> to vector<8x128xf32>
    "tpu.trace_start"() <{level = 10 : i32, message = "bnm,bmd->bnd"}> : () -> ()
    %cst_11 = arith.constant dense<0.000000e+00> : vector<1x8x128xf32>
    %28 = tpu.matmul %22, %25, %cst_11 {dimension_numbers = #tpu.dot_dimension_numbers<[2], [1], [1], [2], [0, 0, 0, 1, 1, 2], [0], [0]>} : vector<1x8x8xf32>, vector<1x8x128xf32>, vector<1x8x128xf32> -> vector<1x8x128xf32>
    "tpu.trace_stop"() : () -> ()
    %29 = vector.shape_cast %28 : vector<1x8x128xf32> to vector<8x128xf32>
    %30 = tpu.reciprocal %29 : vector<8x128xf32> -> vector<8x128xf32>
    %31 = arith.mulf %27, %30 : vector<8x128xf32>
    %32 = arith.cmpf one, %31, %31 : vector<8x128xf32>
    %cst_12 = arith.constant 0.000000e+00 : f32
    %33 = vector.broadcast %cst_12 : f32 to vector<8x128xf32>
    %34 = arith.select %32, %33, %31 : vector<8x128xi1>, vector<8x128xf32>
    %35 = arith.mulf %17, %34 : vector<8x128xf32>
    %36 = arith.addf %6, %35 : vector<8x128xf32>
    %37 = vector.shape_cast %36 : vector<8x128xf32> to vector<1x8x128xf32>
    %c0_13 = arith.constant 0 : index
    %c0_14 = arith.constant 0 : index
    %c0_15 = arith.constant 0 : index
    %38 = vector.load %arg8[%c0_13, %c0_14, %c0_15] : memref<1x1x128xf32, #tpu.memory_space<vmem>>, vector<1x1x128xf32>
    %39 = vector.shape_cast %38 : vector<1x1x128xf32> to vector<1x128xf32>
    %c0_16 = arith.constant 0 : index
    %c0_17 = arith.constant 0 : index
    %c0_18 = arith.constant 0 : index
    %40 = vector.load %arg9[%c0_16, %c0_17, %c0_18] : memref<1x1x128xf32, #tpu.memory_space<vmem>>, vector<1x1x128xf32>
    %41 = vector.shape_cast %40 : vector<1x1x128xf32> to vector<1x128xf32>
    %cst_19 = arith.constant dense<0.000000e+00> : vector<1x128xf32>
    %42 = vector.multi_reduction <add>, %37, %cst_19 [1] : vector<1x8x128xf32> to vector<1x128xf32>
    %43 = vector.shape_cast %42 : vector<1x128xf32> to vector<1x1x128xf32>
    %cst_20 = arith.constant 8.000000e+00 : f32
    %44 = vector.broadcast %cst_20 : f32 to vector<1x1x128xf32>
    %45 = arith.divf %43, %44 : vector<1x1x128xf32>
    %46 = vector.broadcast %45 : vector<1x1x128xf32> to vector<1x8x128xf32>
    %47 = arith.subf %37, %46 : vector<1x8x128xf32>
    %48 = arith.mulf %47, %47 : vector<1x8x128xf32>
    %cst_21 = arith.constant dense<0.000000e+00> : vector<1x128xf32>
    %49 = vector.multi_reduction <add>, %48, %cst_21 [1] : vector<1x8x128xf32> to vector<1x128xf32>
    %50 = vector.shape_cast %49 : vector<1x128xf32> to vector<1x1x128xf32>
    %cst_22 = arith.constant 8.000000e+00 : f32
    %51 = vector.broadcast %cst_22 : f32 to vector<1x1x128xf32>
    %52 = arith.divf %50, %51 : vector<1x1x128xf32>
    %cst_23 = arith.constant 9.99999974E-6 : f32
    %53 = vector.broadcast %cst_23 : f32 to vector<1x1x128xf32>
    %54 = arith.addf %52, %53 : vector<1x1x128xf32>
    %55 = math.rsqrt %54 : vector<1x1x128xf32>
    %56 = vector.broadcast %55 : vector<1x1x128xf32> to vector<1x8x128xf32>
    %57 = arith.mulf %47, %56 : vector<1x8x128xf32>
    %58 = vector.shape_cast %39 : vector<1x128xf32> to vector<1x1x128xf32>
    %59 = vector.broadcast %58 : vector<1x1x128xf32> to vector<1x8x128xf32>
    %60 = arith.mulf %57, %59 : vector<1x8x128xf32>
    %61 = vector.shape_cast %41 : vector<1x128xf32> to vector<1x1x128xf32>
    %62 = vector.broadcast %61 : vector<1x1x128xf32> to vector<1x8x128xf32>
    %63 = arith.addf %60, %62 : vector<1x8x128xf32>
    %64 = vector.shape_cast %63 : vector<1x8x128xf32> to vector<8x128xf32>
    %c0_24 = arith.constant 0 : index
    %c0_25 = arith.constant 0 : index
    %c0_26 = arith.constant 0 : index
    %65 = vector.load %arg10[%c0_24, %c0_25, %c0_26] : memref<1x128x128xf32, #tpu.memory_space<vmem>>, vector<1x128x128xf32>
    %66 = vector.shape_cast %65 : vector<1x128x128xf32> to vector<128x128xf32>
    %cst_27 = arith.constant dense<0.000000e+00> : vector<8x128xf32>
    %67 = tpu.matmul %64, %66, %cst_27 {dimension_numbers = #tpu.dot_dimension_numbers<[1], [0], [0], [1], [0, 0, 1, 1], [], []>} : vector<8x128xf32>, vector<128x128xf32>, vector<8x128xf32> -> vector<8x128xf32>
    %c0_28 = arith.constant 0 : index
    %c0_29 = arith.constant 0 : index
    %c0_30 = arith.constant 0 : index
    %68 = vector.load %arg11[%c0_28, %c0_29, %c0_30] : memref<1x1x128xf32, #tpu.memory_space<vmem>>, vector<1x1x128xf32>
    %69 = vector.shape_cast %68 : vector<1x1x128xf32> to vector<1x128xf32>
    %70 = vector.broadcast %69 : vector<1x128xf32> to vector<8x128xf32>
    %71 = arith.addf %67, %70 : vector<8x128xf32>
    %cst_31 = arith.constant 0.000000e+00 : f32
    %72 = vector.broadcast %cst_31 : f32 to vector<8x128xf32>
    %73 = arith.maximumf %71, %72 : vector<8x128xf32>
    %c0_32 = arith.constant 0 : index
    %c0_33 = arith.constant 0 : index
    %c0_34 = arith.constant 0 : index
    %74 = vector.load %arg12[%c0_32, %c0_33, %c0_34] : memref<1x128x128xf32, #tpu.memory_space<vmem>>, vector<1x128x128xf32>
    %75 = vector.shape_cast %74 : vector<1x128x128xf32> to vector<128x128xf32>
    %cst_35 = arith.constant dense<0.000000e+00> : vector<8x128xf32>
    %76 = tpu.matmul %73, %75, %cst_35 {dimension_numbers = #tpu.dot_dimension_numbers<[1], [0], [0], [1], [0, 0, 1, 1], [], []>} : vector<8x128xf32>, vector<128x128xf32>, vector<8x128xf32> -> vector<8x128xf32>
    %c0_36 = arith.constant 0 : index
    %c0_37 = arith.constant 0 : index
    %c0_38 = arith.constant 0 : index
    %77 = vector.load %arg13[%c0_36, %c0_37, %c0_38] : memref<1x1x128xf32, #tpu.memory_space<vmem>>, vector<1x1x128xf32>
    %78 = vector.shape_cast %77 : vector<1x1x128xf32> to vector<1x128xf32>
    %79 = vector.broadcast %78 : vector<1x128xf32> to vector<8x128xf32>
    %80 = arith.addf %76, %79 : vector<8x128xf32>
    %81 = arith.addf %64, %80 : vector<8x128xf32>
    %82 = vector.shape_cast %81 : vector<8x128xf32> to vector<1x8x128xf32>
    %c0_39 = arith.constant 0 : index
    %c0_40 = arith.constant 0 : index
    %c0_41 = arith.constant 0 : index
    %83 = vector.load %arg14[%c0_39, %c0_40, %c0_41] : memref<1x1x128xf32, #tpu.memory_space<vmem>>, vector<1x1x128xf32>
    %84 = vector.shape_cast %83 : vector<1x1x128xf32> to vector<1x128xf32>
    %c0_42 = arith.constant 0 : index
    %c0_43 = arith.constant 0 : index
    %c0_44 = arith.constant 0 : index
    %85 = vector.load %arg15[%c0_42, %c0_43, %c0_44] : memref<1x1x128xf32, #tpu.memory_space<vmem>>, vector<1x1x128xf32>
    %86 = vector.shape_cast %85 : vector<1x1x128xf32> to vector<1x128xf32>
    %cst_45 = arith.constant dense<0.000000e+00> : vector<1x128xf32>
    %87 = vector.multi_reduction <add>, %82, %cst_45 [1] : vector<1x8x128xf32> to vector<1x128xf32>
    %88 = vector.shape_cast %87 : vector<1x128xf32> to vector<1x1x128xf32>
    %cst_46 = arith.constant 8.000000e+00 : f32
    %89 = vector.broadcast %cst_46 : f32 to vector<1x1x128xf32>
    %90 = arith.divf %88, %89 : vector<1x1x128xf32>
    %91 = vector.broadcast %90 : vector<1x1x128xf32> to vector<1x8x128xf32>
    %92 = arith.subf %82, %91 : vector<1x8x128xf32>
    %93 = arith.mulf %92, %92 : vector<1x8x128xf32>
    %cst_47 = arith.constant dense<0.000000e+00> : vector<1x128xf32>
    %94 = vector.multi_reduction <add>, %93, %cst_47 [1] : vector<1x8x128xf32> to vector<1x128xf32>
    %95 = vector.shape_cast %94 : vector<1x128xf32> to vector<1x1x128xf32>
    %cst_48 = arith.constant 8.000000e+00 : f32
    %96 = vector.broadcast %cst_48 : f32 to vector<1x1x128xf32>
    %97 = arith.divf %95, %96 : vector<1x1x128xf32>
    %cst_49 = arith.constant 9.99999974E-6 : f32
    %98 = vector.broadcast %cst_49 : f32 to vector<1x1x128xf32>
    %99 = arith.addf %97, %98 : vector<1x1x128xf32>
    %100 = math.rsqrt %99 : vector<1x1x128xf32>
    %101 = vector.broadcast %100 : vector<1x1x128xf32> to vector<1x8x128xf32>
    %102 = arith.mulf %92, %101 : vector<1x8x128xf32>
    %103 = vector.shape_cast %84 : vector<1x128xf32> to vector<1x1x128xf32>
    %104 = vector.broadcast %103 : vector<1x1x128xf32> to vector<1x8x128xf32>
    %105 = arith.mulf %102, %104 : vector<1x8x128xf32>
    %106 = vector.shape_cast %86 : vector<1x128xf32> to vector<1x1x128xf32>
    %107 = vector.broadcast %106 : vector<1x1x128xf32> to vector<1x8x128xf32>
    %108 = arith.addf %105, %107 : vector<1x8x128xf32>
    %c0_50 = arith.constant 0 : index
    %c0_51 = arith.constant 0 : index
    %c0_52 = arith.constant 0 : index
    %109 = vector.load %arg17[%c0_50, %c0_51, %c0_52] : memref<1x8x128xf32, #tpu.memory_space<vmem>>, vector<1x8x128xf32>
    tpu.vector_store %arg17[%c0_50, %c0_51, %c0_52], %108 {strides = array<i32>} : memref<1x8x128xf32, #tpu.memory_space<vmem>>, vector<1x8x128xf32>,
    %c1_i32 = arith.constant 1 : i32
    %110 = arith.cmpi eq, %arg1, %c1_i32 : i32
    %111 = arith.extui %110 : i1 to i32
    %c0_i32_53 = arith.constant 0 : i32
    %112 = arith.cmpi ne, %111, %c0_i32_53 : i32
    scf.if %112 {
      %c0_54 = arith.constant 0 : index
      %c0_55 = arith.constant 0 : index
      %c0_56 = arith.constant 0 : index
      %113 = vector.load %arg16[%c0_54, %c0_55, %c0_56] : memref<1x8x128xf32, #tpu.memory_space<vmem>>, vector<1x8x128xf32>
      tpu.vector_store %arg16[%c0_54, %c0_55, %c0_56], %108 {strides = array<i32>} : memref<1x8x128xf32, #tpu.memory_space<vmem>>, vector<1x8x128xf32>,
    } else {
    }
    return
  }
  func.func @transform_0(%arg0: i32, %arg1: i32) -> i32 {
    %c0_i32 = arith.constant 0 : i32
    %c0_i32_0 = arith.constant 0 : i32
    return %c0_i32 : i32
  }
  func.func @transform_1(%arg0: i32, %arg1: i32) -> (i32, i32, i32) {
    %c0_i32 = arith.constant 0 : i32
    %c0_i32_0 = arith.constant 0 : i32
    %c0_i32_1 = arith.constant 0 : i32
    return %arg0, %c0_i32, %c0_i32_0 : i32, i32, i32
  }
  func.func @transform_2(%arg0: i32, %arg1: i32) -> (i32, i32, i32) {
    %c0_i32 = arith.constant 0 : i32
    %c0_i32_0 = arith.constant 0 : i32
    %c0_i32_1 = arith.constant 0 : i32
    return %arg0, %c0_i32, %c0_i32_0 : i32, i32, i32
  }
  func.func @transform_3(%arg0: i32, %arg1: i32) -> (i32, i32) {
    %c0_i32 = arith.constant 0 : i32
    %c0_i32_0 = arith.constant 0 : i32
    %c0_i32_1 = arith.constant 0 : i32
    return %c0_i32, %c0_i32_0 : i32, i32
  }
  func.func @transform_4(%arg0: i32, %arg1: i32) -> (i32, i32) {
    %c0_i32 = arith.constant 0 : i32
    %c0_i32_0 = arith.constant 0 : i32
    %c0_i32_1 = arith.constant 0 : i32
    return %c0_i32, %c0_i32_0 : i32, i32
  }
  func.func @transform_5(%arg0: i32, %arg1: i32) -> (i32, i32, i32) {
    %c0_i32 = arith.constant 0 : i32
    %c0_i32_0 = arith.constant 0 : i32
    %c0_i32_1 = arith.constant 0 : i32
    return %arg1, %c0_i32, %c0_i32_0 : i32, i32, i32
  }
  func.func @transform_6(%arg0: i32, %arg1: i32) -> (i32, i32, i32) {
    %c0_i32 = arith.constant 0 : i32
    %c0_i32_0 = arith.constant 0 : i32
    %c0_i32_1 = arith.constant 0 : i32
    return %arg1, %c0_i32, %c0_i32_0 : i32, i32, i32
  }
  func.func @transform_7(%arg0: i32, %arg1: i32) -> (i32, i32, i32) {
    %c0_i32 = arith.constant 0 : i32
    %c0_i32_0 = arith.constant 0 : i32
    %c0_i32_1 = arith.constant 0 : i32
    return %arg1, %c0_i32, %c0_i32_0 : i32, i32, i32
  }
  func.func @transform_8(%arg0: i32, %arg1: i32) -> (i32, i32, i32) {
    %c0_i32 = arith.constant 0 : i32
    %c0_i32_0 = arith.constant 0 : i32
    %c0_i32_1 = arith.constant 0 : i32
    return %arg1, %c0_i32, %c0_i32_0 : i32, i32, i32
  }
  func.func @transform_9(%arg0: i32, %arg1: i32) -> (i32, i32, i32) {
    %c0_i32 = arith.constant 0 : i32
    %c0_i32_0 = arith.constant 0 : i32
    %c0_i32_1 = arith.constant 0 : i32
    return %arg1, %c0_i32, %c0_i32_0 : i32, i32, i32
  }
  func.func @transform_10(%arg0: i32, %arg1: i32) -> (i32, i32, i32) {
    %c0_i32 = arith.constant 0 : i32
    %c0_i32_0 = arith.constant 0 : i32
    %c0_i32_1 = arith.constant 0 : i32
    return %arg1, %c0_i32, %c0_i32_0 : i32, i32, i32
  }
  func.func @transform_11(%arg0: i32, %arg1: i32) -> (i32, i32, i32) {
    %c0_i32 = arith.constant 0 : i32
    %c0_i32_0 = arith.constant 0 : i32
    %c0_i32_1 = arith.constant 0 : i32
    return %arg1, %c0_i32, %c0_i32_0 : i32, i32, i32
  }
  func.func @transform_12(%arg0: i32, %arg1: i32) -> (i32, i32, i32) {
    %c0_i32 = arith.constant 0 : i32
    %c0_i32_0 = arith.constant 0 : i32
    %c0_i32_1 = arith.constant 0 : i32
    return %arg1, %c0_i32, %c0_i32_0 : i32, i32, i32
  }
  func.func @transform_13(%arg0: i32, %arg1: i32) -> (i32, i32, i32) {
    %c0_i32 = arith.constant 0 : i32
    %c0_i32_0 = arith.constant 0 : i32
    %c0_i32_1 = arith.constant 0 : i32
    return %arg1, %c0_i32, %c0_i32_0 : i32, i32, i32
  }
  func.func @transform_14(%arg0: i32, %arg1: i32) -> (i32, i32, i32) {
    %c0_i32 = arith.constant 0 : i32
    %c0_i32_0 = arith.constant 0 : i32
    %c0_i32_1 = arith.constant 0 : i32
    return %arg0, %c0_i32, %c0_i32_0 : i32, i32, i32
  }
}

</mosaic_0001>

<bundles_post_ra>
// kernel: tpu_custom_call.1
= control target key start
LH: loop header
LB: loop body
LE: loop exit
PB: predicated region body
PF: predicated region fallthrough
CT: control target
= control target key end

     0   :  { %s2342_s0 = inlined_call_operand.hbm [shape: f32[2], index: 0, kind: input, shape index: {}]   ;;  %s2343_s1 = inlined_call_operand.vmem [shape: f32[2,8,2], index: 1, kind: input, shape index: {}]   ;;  %s2344_s2 = inlined_call_operand.vmem [shape: f32[2,8,8], index: 2, kind: input, shape index: {}]   ;;  %s2345_s3 = inlined_call_operand.vmem [shape: f32[2,128], index: 3, kind: input, shape index: {}]   ;;  %s2346_s4 = inlined_call_operand.hbm [shape: f32[1,128], index: 4, kind: input, shape index: {}]   ;;  %s2347_s5 = inlined_call_operand.hbm [shape: f32[2,128,384], index: 5, kind: input, shape index: {}]   ;;  %s2348_s6 = inlined_call_operand.vmem [shape: f32[2,1,128], index: 6, kind: input, shape index: {}]   ;;  %s2349_s7 = inlined_call_operand.vmem [shape: f32[2,1,128], index: 7, kind: input, shape index: {}]   ;;  %s2350_s8 = inlined_call_operand.hbm [shape: f32[2,128,128], index: 8, kind: input, shape index: {}]   ;;  %s2351_s9 = inlined_call_operand.vmem [shape: f32[2,1,128], index: 9, kind: input, shape index: {}]   ;;  %s2352_s10 = inlined_call_operand.hbm [shape: f32[2,128,128], index: 10, kind: input, shape index: {}]   ;;  %s2353_s11 = inlined_call_operand.vmem [shape: f32[2,1,128], index: 11, kind: input, shape index: {}]   ;;  %s2354_s12 = inlined_call_operand.vmem [shape: f32[2,1,128], index: 12, kind: input, shape index: {}]   ;;  %s2355_s13 = inlined_call_operand.vmem [shape: f32[2,1,128], index: 13, kind: input, shape index: {}]   ;;  %s2356_s14 = inlined_call_operand.hbm [shape: f32[2,8,128], index: 14, kind: output, shape index: {}]  }
   0x1   :  { %2374 = sst [smem:[#allocation33_spill]] %s2342_s0 }
   0x2   :  { %2375 = sst [smem:[#allocation34_spill]] %s2343_s1 }
   0x3   :  { %2376 = sst [smem:[#allocation35_spill]] %s2344_s2 }
   0x4   :  { %2377 = sst [smem:[#allocation36_spill]] %s2345_s3 }
   0x5   :  { %2378 = sst [smem:[#allocation37_spill]] %s2346_s4 }
   0x6   :  { %2379 = sst [smem:[#allocation38_spill]] %s2347_s5 }
   0x7   :  { %2380 = sst [smem:[#allocation39_spill]] %s2348_s6 }
   0x8   :  { %2381 = sst [smem:[#allocation40_spill]] %s2349_s7 }
   0x9   :  { %2382 = sst [smem:[#allocation41_spill]] %s2350_s8 }
   0xa   :  { %2383 = sst [smem:[#allocation42_spill]] %s2351_s9 }
   0xb   :  { %2384 = sst [smem:[#allocation43_spill]] %s2352_s10 }
   0xc   :  { %2385 = sst [smem:[#allocation44_spill]] %s2353_s11 }
   0xd   :  { %2386 = sst [smem:[#allocation45_spill]] %s2354_s12 }
   0xe   :  { %2387 = sst [smem:[#allocation46_spill]] %s2355_s13 }
   0xf   :  { %2388 = sst [smem:[#allocation47_spill]] %s2356_s14 }
  0x10   :  { %19 = vsyncpa [#allocation6], 0 }
  0x11   :  { %20 = vsyncpa [#allocation4], 0 }
  0x12   :  { %21 = vsyncpa [#allocation9], 0 }
  0x13   :  { %23 = vsyncpa [#allocation9 + $0x1], 0 }
  0x14   :  { %24 = vsyncpa [#allocation12], 0 }
  0x15   :  { %26 = vsyncpa [#allocation12 + $0x1], 0 }
  0x16   :  { %27 = vsyncpa [#allocation5], 0 }
  0x17   :  { %29 = vsyncpa [#allocation5 + $0x1], 0  ;;  %s1925_s29 = smov 0   ;;  %s1927_s30 = smov 0  }
  0x18   :  { %s1929_s15 = smov 0   ;;  %s1931_s16 = smov 0  }
  0x19   :  { %s1933_s17 = smov 0   ;;  %s1935_s18 = smov 0  }
  0x1a   :  { %s1937_s19 = smov 0   ;;  %s1939_s20 = smov 0  }
  0x1b   :  { %s1941_s21 = smov 0   ;;  %s1943_s22 = smov 0  }
  0x1c   :  { %s1945_s23 = smov 0  }
  0x1d LB: > { %2389 = sst [smem:[#allocation19_spill]] %s1799_s29  ;;  %s44_s24 = sadd.s32 1, %s1831_s21  ;;  %s1839_s23 = sphi %s1945_s23, %s35_s23   ;;  %s1835_s22 = sphi %s1943_s22, %s2448_s22   ;;  %s1831_s21 = sphi %s1941_s21, %s2447_s21   ;;  %s1827_s20 = sphi %s1939_s20, %s2446_s20   ;;  %s1823_s19 = sphi %s1937_s19, %s2445_s19   ;;  %s1819_s18 = sphi %s1935_s18, %s2444_s18   ;;  %s1815_s17 = sphi %s1933_s17, %s2443_s17   ;;  %s1811_s16 = sphi %s1931_s16, %s2442_s16   ;;  %s1807_s15 = sphi %s1929_s15, %s2441_s15   ;;  %s1803_s30 = sphi %s1927_s30, %s2440_s30   ;;  %s1799_s29 = sphi %s1925_s29, %s2439_s29  }
  0x1e   : > { %2390 = sst [smem:[#allocation20_spill]] %s1803_s30  ;;  %s47_s25 = sadd.s32 1, %s1835_s22 }
  0x1f   : > { %2391 = sst [smem:[#allocation21_spill]] %s1807_s15  ;;  %p45_p0 = scmp.ge.s32.totalorder %s44_s24, 2 }
  0x20   : > { %2392 = sst [smem:[#allocation22_spill]] %s1815_s17  ;;  %s169_s26 = sadd.s32 1, %s1819_s18 }
  0x21   : > { %2393 = sst [smem:[#allocation23_spill]] %s1819_s18  ;;  %p176_p1 = scmp.ne.s32.totalorder %s1819_s18, %s1815_s17 }
  0x22   : > { %2394 = sst [smem:[#allocation24_spill]] %s1831_s21  ;;  %p177_p2 = scmp.eq.s32.totalorder %s1839_s23, 0 }
  0x23   : > { %2395 = sst [smem:[#allocation25_spill]] %s1835_s22  ;;  %s2450_s24 = smov (%p45_p0, %s44_s24), 0 }
  0x24   : > { %2396 = sst [smem:[#allocation26_spill]] %s1839_s23  ;;  %s2452_s25 = smov (!%p45_p0, %s47_s25), %s1835_s22 }
  0x25   : > { %2397 = sst [smem:[#allocation27_spill]] %s2450_s24  ;;  %s166_s27 = ssub.s32 %s1831_s21, %s2450_s24 }
  0x26   : > { %p178_p3 = por %p177_p2, %p176_p1  ;;  %p49_p4 = scmp.ge.s32.totalorder %s2452_s25, 2 }
  0x27   : > { %p167_p5 = scmp.eq.s32.totalorder %s166_s27, 0  ;;  %p1442_p6 = scmp.lt.s32.totalorder %s1839_s23, 4 }
  0x28   : > { %s2454_s25 = smov (%p49_p4, %s2452_s25), 0  ;;  %s479_s14 = sand.u32 1, %s1839_s23  }
  0x29   : > { %2398 = sst [smem:[#allocation28_spill]] %s2454_s25  ;;  %s1999_s3 = sand.u32 1, %s1819_s18  }
  0x2a   : > { %s1995_s28 = scalar_select %p167_p5, %s1819_s18, %s169_s26  }
  0x2b   : > { %s1400_s13 = smul.u32 384, %s1999_s3  ;;  %p2003_p7 = pnand %p1442_p6, %p178_p3 }
  0x2c   : > { %2399 = sst [smem:[#allocation29_spill]] %s1995_s28  ;;  %s1401_s12 = smul.u32 384, %s1831_s21 }
  0x2d   : > { %s2401_s5 = sld [smem:[#allocation38_spill]]  ;;  %s483_s28 = scalar_lea.vmem [#allocation8], %s1400_s13 }
  0x2e   : > { %s491_s18 = sshll.u32 %s483_s28, 4  ;;  %s2010_s7 = scalar_lea.sflag [#allocation9], %s479_s14  ;;  %s492_s18 = int_to_ptr.vmem [resolvable:$true] %s491_s18 }
  0x2f   : > { %s1841_s6 = smov 384   ;;  %s1842_s2 = smov 24  }
  0x30   : > { %s2016_s11 = sadd.s32 4294967295, %s1839_s23   ;;  %p182_p8 = scmp.ne.s32.totalorder %s1815_s17, %s1811_s16 }
  0x31   : > { %p183_p9 = scmp.eq.s32.totalorder %s2016_s11, 0  ;;  %s400_s13 = ssub.s32 %s1835_s22, %s2454_s25 }
  0x32   : > { %p401_p10 = scmp.eq.s32.totalorder %s400_s13, 0  ;;  %s403_s28 = sadd.s32 1, %s1807_s15 }
  0x33   : > { %s488_s26 = scalar_lea.hbm %s2401_s5, %s1401_s12  ;;  %s1369_s12 = sadd.s32 4294967294, %s1839_s23  }
  0x34   : > { %s489_s9 = sshll.u32 %s488_s26, 4  ;;  %p2027_p11 = por %p183_p9, %p182_p8  ;;  %s490_s9 = int_to_ptr.hbm [resolvable:$true] %s489_s9 }
  0x35   : > { %1429 = dma.hbm_to_vmem [thread:$0]  (!%p2003_p7), %s490_s9, 6144, %s492_s18, %s2010_s7, %s1841_s6, %s1841_s6, %s1842_s2  }
  0x36   : > { %p413_p12 = scmp.ne.s32.totalorder %s1807_s15, %s1803_s30  ;;  %p414_p13 = scmp.eq.s32.totalorder %s2016_s11, 3 }
  0x37   : > { %s2034_s2 = scalar_select %p401_p10, %s1807_s15, %s403_s28  }
  0x38   : > { %p419_p0 = scmp.ne.s32.totalorder %s1803_s30, %s1799_s29  ;;  %p420_p1 = scmp.eq.s32.totalorder %s1369_s12, 3 }
  0x39   : > { %2403 = sst [smem:[#allocation30_spill]] %s2034_s2  ;;  %p1370_p2 = scmp.ge.s32.totalorder %s1839_s23, 1 }
  0x3a   : > { %p2040_p3 = por %p414_p13, %p413_p12  ;;  %p427_p4 = scmp.lt.s32.totalorder %s1839_s23, 5 }
  0x3b   : > { %p2045_p5 = por %p420_p1, %p419_p0  ;;  %s2409_s0 = sld [smem:[#allocation33_spill]] }
  0x3c   : > { %s2404_s6 = scalar_select %p2040_p3, 1, 0 }
  0x3d   : > { %s2406_s9 = scalar_select %p2045_p5, 1, 0 }
  0x3e   : > { %2405 = sst [smem:[#allocation31_spill]] %s2404_s6  ;;  %p2049_p6 = pnand %p1370_p2, %p427_p4 }
  0x3f   : > { %2407 = sst [smem:[#allocation32_spill]] %s2406_s9  ;;  %s1843_s5 = smov [#allocation7]  }
  0x40   : > { %p1419_p8 = pneg %p2049_p6  ;;  %s2410_s4 = sld [smem:[#allocation37_spill]] }
  0x41   : > { %s439_s26 = sshll.u32 %s2409_s0, 4  ;;  %s454_s25 = sshll.u32 %s1843_s5, 4  ;;  %s440_s26 = int_to_ptr.hbm [resolvable:$true] %s439_s26  ;;  %s455_s25 = int_to_ptr.vmem [resolvable:$true] %s454_s25 }
  0x42   : > { %p1420_p10 = pnand %p1419_p8, %p183_p9  ;;  %s1375_s22 = sshll.u32 %s1999_s3, 7 }
  0x43   : > { %s1844_s2 = smov [#allocation3]   ;;  %s1398_s18 = sshll.u32 %s1831_s21, 7 }
  0x44   : > { %1422 = dma.hbm_to_smem (!%p1420_p10), %s440_s26, 16, %s1844_s2, [#allocation6]  }
  0x45   : > { %s517_s27 = scalar_lea.vmem [#allocation10], %s1375_s22  ;;  %s2411_s8 = sld [smem:[#allocation41_spill]] }
  0x46   : > { %s452_s28 = sshll.u32 %s2410_s4, 4  ;;  %s525_s0 = sshll.u32 %s517_s27, 4  ;;  %s453_s28 = int_to_ptr.hbm [resolvable:$true] %s452_s28  ;;  %s526_s0 = int_to_ptr.vmem [resolvable:$true] %s525_s0 }
  0x47   : > { %1425 = dma.hbm_to_vmem [thread:$0]  (!%p1420_p10), %s453_s28, 16, %s455_s25, [#allocation4]  }
  0x48   : > { %s1845_s9 = smov 128   ;;  %s1846_s29 = smov 8  }
  0x49   : > { %s2412_s10 = sld [smem:[#allocation43_spill]]  ;;  %s545_s2 = scalar_lea.vmem [#allocation11], %s1375_s22 }
  0x4a   : > { %s553_s26 = sshll.u32 %s545_s2, 4  ;;  %s542_s27 = scalar_lea.sflag [#allocation12], %s1999_s3  ;;  %s554_s26 = int_to_ptr.vmem [resolvable:$true] %s553_s26 }
  0x4b   : > { %s522_s13 = scalar_lea.hbm %s2411_s8, %s1398_s18 }
  0x4c   : > { %s523_s4 = sshll.u32 %s522_s13, 4  ;;  %s524_s4 = int_to_ptr.hbm [resolvable:$true] %s523_s4 }
  0x4d   : > { %1432 = dma.hbm_to_vmem [thread:$0]  (!%p2003_p7), %s524_s4, 2048, %s526_s0, %s2010_s7, %s1845_s9, %s1845_s9, %s1846_s29  }
  0x4e   : > { %583 = sbr.rel (%p2049_p6) target bundleno = 987 (0x3db), region = 76 }
  0x4f   : > { %s550_s25 = scalar_lea.hbm %s2412_s10, %s1398_s18 }
  0x50   : > { %s551_s28 = sshll.u32 %s550_s25, 4  ;;  %s552_s28 = int_to_ptr.hbm [resolvable:$true] %s551_s28 }
  0x51   : > { %1435 = dma.hbm_to_vmem [thread:$0]  (!%p2003_p7), %s552_s28, 2048, %s554_s26, %s542_s27, %s1845_s9, %s1845_s9, %s1846_s29  }
  0x53   : > { %1778 = dma.done.wait (%p183_p9), [#allocation6], 16  }
  0x54   : > { %1780 = vsyncadd (%p183_p9), [#allocation6], 4294967280 }
  0x55   : > { %1782 = dma.done.wait (%p183_p9), [#allocation4], 16  }
  0x56   : > { %1784 = vsyncadd (%p183_p9), [#allocation4], 4294967280  ;;  %s595_s0 = sand.u32 1, %s2016_s11   ;;  %s597_s3 = sand.u32 1, %s1815_s17  }
  0x57   : > { %s1402_s4 = smul.u32 384, %s597_s3  ;;  %s596_s7 = scalar_lea.sflag [#allocation9], %s595_s0 }
  0x59   : > { %s2089_s29 = scalar_lea.vmem [#allocation8], %s1402_s4 }
  0x5a   : > { %1786 = dma.done.wait (%p2027_p11), %s596_s7, 8192  }
  0x5b   : > { %1788 = vsyncadd (%p2027_p11), %s596_s7, 4294959104  ;;  %s1384_s15 = sshll.u32 %s597_s3, 7  ;;  %s616_s23 = scalar_lea.sflag [#allocation12], %s597_s3 }
  0x5c   : > { %s2095_s22 = scalar_lea.vmem [#allocation10], %s1384_s15  ;;  %s2097_s24 = scalar_lea.vmem [#allocation11], %s1384_s15 }
  0x5d   : > { %1790 = dma.done.wait (%p2027_p11), %s616_s23, 2048  }
  0x5e   : > { %1792 = vsyncadd (%p2027_p11), %s616_s23, 4294965248 }
  0x5f   : > { %625 = sfence }
  0x60   : > { %s2368_s11 = sand.u32 1, %s1803_s30   ;;  %p702_p7 = scmp.lt.s32.totalorder %s1827_s20, 1 }
  0x61   : > { %s2107_s9 = sshll.u32 %s2368_s11, 3  ;;  %p710_p9 = scmp.lt.s32.totalorder %s1823_s19, 1 }
  0x62   : > { %s703_s16 = scalar_select %p702_p7, %s1827_s20, 1 }
  0x63   : > { %s2112_s18 = scalar_select %p710_p9, %s1823_s19, 1 }
  0x64   : > { %s1387_s14 = sshll.u32 %s703_s16, 3  ;;  %s2413_s1 = sld [smem:[#allocation34_spill]] }
  0x65   : > { %s2414_s26 = sld [smem:[#allocation35_spill]]  ;;  %p1389_p11 = scmp.ne.s32.totalorder %s1823_s19, 0 }
  0x66   : > { %s2415_s3 = sld [smem:[#allocation39_spill]] }
  0x67   : > { %s2416_s23 = sld [smem:[#allocation40_spill]] }
  0x68   : > { %s2417_s16 = sld [smem:[#allocation42_spill]] }
  0x69   : > { %s2418_s13 = sld [smem:[#allocation44_spill]] }
  0x6a   : > { %s705_s5 = scalar_lea.vmem %s2413_s1, %s1387_s14  ;;  %s2420_s27 = sld [smem:[#allocation46_spill]] }
  0x6b   : > { %s2120_s28 = scalar_lea.vmem %s2414_s26, %s1387_s14  ;;  %s2419_s14 = sld [smem:[#allocation45_spill]] }
  0x6c   : > { %s712_s4 = scalar_lea.vmem %s2415_s3, %s2112_s18  ;;  %s701_s3 = scalar_lea.vmem [#allocation13], %s2107_s9 }
  0x6d   : > { %s715_s11 = scalar_lea.vmem %s2416_s23, %s2112_s18  ;;  %731 = sbr.rel (%p1389_p11) target bundleno = 247 (0xf7), region = 100 }
  0x6e   : > { %s718_s21 = scalar_lea.vmem %s2417_s16, %s2112_s18  ;;  %s2421_s17 = sld [smem:[#allocation36_spill]] (!%p1389_p11) }
  0x6f   : > { %s721_s1 = scalar_lea.vmem %s2418_s13, %s2112_s18 }
  0x70   : > { %s727_s0 = scalar_lea.vmem %s2420_s27, %s2112_s18 }
  0x71   : > { %s724_s2 = scalar_lea.vmem %s2419_s14, %s2112_s18 }
  0x72   : > { %v732_v0 = vld [vmem:[%s705_s5] sm:$0xff]  ;;  %v1847_v1 = vmov 0   ;;  %v1848_v2 = vmov 1   ;;  %v1547_v8 = vld [vmem:[#allocation7] ss:$0 sm:$0xff] }
  0x73   : > { %1543 = vset.pattern.permute.xlu0 %v1847_v1 }
  0x74   : > { %736 = vperm.xlu0 %1543, %v732_v0   ;;  %s2422_s6 = smov %s2421_s17  ;;  %v1545_v4 = vld [vmem:[%s2421_s17] ss:$0 sm:$0xff] }
  0x75   : > { %v1546_v5 = vld [vmem:[%s2422_s6 + $0x1] ss:$0 sm:$0xff] }
  0x7c   : > { %1544 = vset.pattern.permute.xlu0 %v1848_v2 }
  0x7d   : > { %743 = vperm.xlu0 %1544, %v732_v0  }
  0xe6   : > { %v737_v3 = vpop.permute.xlu0 %736 }
  0xe7   : > { %v740_v7 = vmul.f32 %v1545_v4, %v737_v3 }
  0xef   : > { %v744_v6 = vpop.permute.xlu0 %743 }
  0xf0   : > { %v747_v9 = vmul.f32 %v1546_v5, %v744_v6 }
  0xf2   : > { %v748_v10 = vadd.f32 %v747_v9, %v740_v7 }
  0xf4   : > { %v753_v11 = vadd.f32 %v1547_v8, %v748_v10 }
  0xf6   : > { %754 = vst [vmem:[#allocation2] sm:$0xff] %v753_v11 }
  0xf7 PF: > { %v803_v12 = vld [vmem:[%s2089_s29 + $0x170] sm:$0xff]  ;;  %v800_v13 = vld [vmem:[%s2089_s29 + $0x158] sm:$0xff]  ;;  %v801_v15 = vld [vmem:[%s2089_s29 + $0x160] sm:$0xff]  ;;  %s755_s30 = sld [smem:[#allocation3 + %s1823_s19]]  ;;  %vm892_vm0 = vcmask 64512   ;;  %p1393_p12 = scmp.ne.s32.totalorder %s1823_s19, 1 }
  0xf8   : > { %v804_v14 = vld [vmem:[%s2089_s29 + $0x178] sm:$0xff]  ;;  %825 = vmatpush.msra.mxu1 %v803_v12  ;;  %v797_v16 = vld [vmem:[%s2089_s29 + $0x140] sm:$0xff]  ;;  %v798_v17 = vld [vmem:[%s2089_s29 + $0x148] sm:$0xff] }
  0xf9   : > { %845 = vmatpush.msra.mxu2 %v804_v14  ;;  %v794_v18 = vld [vmem:[%s2089_s29 + $0x128] sm:$0xff]  ;;  %v795_v19 = vld [vmem:[%s2089_s29 + $0x130] sm:$0xff]  ;;  %v792_v21 = vld [vmem:[%s2089_s29 + $0x118] sm:$0xff] }
  0xfa   : > { %826 = vmatpush.msra.mxu1 %v800_v13  ;;  %v791_v20 = vld [vmem:[%s2089_s29 + $0x110] sm:$0xff]  ;;  %v788_v22 = vld [vmem:[%s2089_s29 + $0xf8] sm:$0xff]  ;;  %v789_v23 = vld [vmem:[%s2089_s29 + $0x100] sm:$0xff] }
  0xfb   : > { %846 = vmatpush.msra.mxu2 %v801_v15  ;;  %v785_v24 = vld [vmem:[%s2089_s29 + $0xe0] sm:$0xff]  ;;  %v786_v25 = vld [vmem:[%s2089_s29 + $0xe8] sm:$0xff]  ;;  %v799_v27 = vld [vmem:[%s2089_s29 + $0x150] sm:$0xff] }
  0xfc   : > { %827 = vmatpush.msra.mxu1 %v797_v16  ;;  %v802_v26 = vld [vmem:[%s2089_s29 + $0x168] sm:$0xff]  ;;  %v783_v29 = vld [vmem:[%s2089_s29 + $0xd0] sm:$0xff]  ;;  %v796_v31 = vld [vmem:[%s2089_s29 + $0x138] sm:$0xff] }
  0xfd   : > { %847 = vmatpush.msra.mxu2 %v798_v17  ;;  %v782_v28 = vld [vmem:[%s2089_s29 + $0xc8] sm:$0xff]  ;;  %805 = vmatpush.msra.mxu0 %v802_v26  ;;  %v779_v30 = vld [vmem:[%s2089_s29 + $0xb0] sm:$0xff]  ;;  %v776_v32 = vld [vmem:[%s2089_s29 + $0x98] sm:$0xff]  ;;  %v887_v62 = vstv %s755_s30 }
  0xfe   : > { %828 = vmatpush.msra.mxu1 %v794_v18  ;;  %v780_v33 = vld [vmem:[%s2089_s29 + $0xb8] sm:$0xff]  ;;  %v777_v34 = vld [vmem:[%s2089_s29 + $0xa0] sm:$0xff]  ;;  %v790_v36 = vld [vmem:[%s2089_s29 + $0x108] sm:$0xff] }
  0xff   : > { %848 = vmatpush.msra.mxu2 %v795_v19  ;;  %806 = vmatpush.msra.mxu0 %v799_v27  ;;  %v793_v35 = vld [vmem:[%s2089_s29 + $0x120] sm:$0xff]  ;;  %v774_v38 = vld [vmem:[%s2089_s29 + $0x88] sm:$0xff]  ;;  %v787_v39 = vld [vmem:[%s2089_s29 + $0xf0] sm:$0xff] }
 0x100   : > { %829 = vmatpush.msra.mxu1 %v791_v20  ;;  %v773_v37 = vld [vmem:[%s2089_s29 + $0x80] sm:$0xff]  ;;  %v770_v40 = vld [vmem:[%s2089_s29 + $0x68] sm:$0xff]  ;;  %v771_v41 = vld [vmem:[%s2089_s29 + $0x70] sm:$0xff] }
 0x101   : > { %849 = vmatpush.msra.mxu2 %v792_v21  ;;  %807 = vmatpush.msra.mxu0 %v796_v31  ;;  %v784_v42 = vld [vmem:[%s2089_s29 + $0xd8] sm:$0xff]  ;;  %v767_v43 = vld [vmem:[%s2089_s29 + $0x50] sm:$0xff]  ;;  %v781_v45 = vld [vmem:[%s2089_s29 + $0xc0] sm:$0xff] }
 0x102   : > { %830 = vmatpush.msra.mxu1 %v788_v22  ;;  %v768_v44 = vld [vmem:[%s2089_s29 + $0x58] sm:$0xff]  ;;  %v765_v47 = vld [vmem:[%s2089_s29 + $0x40] sm:$0xff]  ;;  %v778_v48 = vld [vmem:[%s2089_s29 + $0xa8] sm:$0xff] }
 0x103   : > { %850 = vmatpush.msra.mxu2 %v789_v23  ;;  %808 = vmatpush.msra.mxu0 %v793_v35  ;;  %v764_v46 = vld [vmem:[%s2089_s29 + $0x38] sm:$0xff]  ;;  %v761_v49 = vld [vmem:[%s2089_s29 + $0x20] sm:$0xff]  ;;  %v762_v50 = vld [vmem:[%s2089_s29 + $0x28] sm:$0xff] }
 0x104   : > { %831 = vmatpush.msra.mxu1 %v785_v24  ;;  %v775_v51 = vld [vmem:[%s2089_s29 + $0x90] sm:$0xff]  ;;  %v758_v52 = vld [vmem:[%s2089_s29 + $0x8] sm:$0xff]  ;;  %v772_v55 = vld [vmem:[%s2089_s29 + $0x78] sm:$0xff] }
 0x105   : > { %851 = vmatpush.msra.mxu2 %v786_v25  ;;  %809 = vmatpush.msra.mxu0 %v790_v36  ;;  %v759_v53 = vld [vmem:[%s2089_s29 + $0x10] sm:$0xff]  ;;  %v769_v56 = vld [vmem:[%s2089_s29 + $0x60] sm:$0xff]  ;;  %v766_v57 = vld [vmem:[%s2089_s29 + $0x48] sm:$0xff] }
 0x106   : > { %832 = vmatpush.msra.mxu1 %v782_v28  ;;  %v2196_v54 = vld [vmem:[#allocation2] sm:$0xff]  ;;  %v757_v60 = vld [vmem:[%s2089_s29] sm:$0xff]  ;;  %v1013_v14 = vld [vmem:[%s2095_s22 + $0x68] sm:$0xff] }
 0x107   : > { %852 = vmatpush.msra.mxu2 %v783_v29  ;;  %810 = vmatpush.msra.mxu0 %v787_v39  ;;  %v763_v58 = vld [vmem:[%s2089_s29 + $0x30] sm:$0xff]  ;;  %v760_v59 = vld [vmem:[%s2089_s29 + $0x18] sm:$0xff]  ;;  %v1012_v15 = vld [vmem:[%s2095_s22 + $0x60] sm:$0xff] }
 0x108   : > { %833 = vmatpush.msra.mxu1 %v779_v30  ;;  %v886_v61 = vld [vmem:[%s2120_s28] sm:$0xff]  ;;  %v1009_v21 = vld [vmem:[%s2095_s22 + $0x48] sm:$0xff]  ;;  %v1008_v23 = vld [vmem:[%s2095_s22 + $0x40] sm:$0xff]  ;;  %v1849_v30 = vmov 8.0  }
 0x109   : > { %853 = vmatpush.msra.mxu2 %v780_v33  ;;  %811 = vmatpush.msra.mxu0 %v784_v42  ;;  %v888_v63 = vmul.f32 %v887_v62, %v886_v61  ;;  %v1015_v12 = vld [vmem:[%s2095_s22 + $0x78] sm:$0xff]  ;;  %v1014_v13 = vld [vmem:[%s2095_s22 + $0x70] sm:$0xff] }
 0x10a   : > { %834 = vmatpush.msra.mxu1 %v776_v32  ;;  %v1011_v18 = vld [vmem:[%s2095_s22 + $0x58] sm:$0xff]  ;;  %v1010_v20 = vld [vmem:[%s2095_s22 + $0x50] sm:$0xff] }
 0x10b   : > { %854 = vmatpush.msra.mxu2 %v777_v34  ;;  %812 = vmatpush.msra.mxu0 %v781_v45  ;;  %v889_v1 = vmul.f32 1.442695, %v888_v63  ;;  %v1007_v26 = vld [vmem:[%s2095_s22 + $0x38] sm:$0xff]  ;;  %v1006_v29 = vld [vmem:[%s2095_s22 + $0x30] sm:$0xff]  ;;  %v1005_v34 = vld [vmem:[%s2095_s22 + $0x28] sm:$0xff] }
 0x10c   : > { %835 = vmatpush.msra.mxu1 %v773_v37 }
 0x10d   : > { %855 = vmatpush.msra.mxu2 %v774_v38  ;;  %813 = vmatpush.msra.mxu0 %v778_v48 }
 0x10e   : > { %836 = vmatpush.msra.mxu1 %v770_v40  ;;  %v1004_v40 = vld [vmem:[%s2095_s22 + $0x20] sm:$0xff] }
 0x10f   : > { %856 = vmatpush.msra.mxu2 %v771_v41  ;;  %814 = vmatpush.msra.mxu0 %v775_v51  ;;  %v1001_v51 = vld [vmem:[%s2095_s22 + $0x8] sm:$0xff] }
 0x110   : > { %837 = vmatpush.msra.mxu1 %v767_v43 }
 0x111   : > { %857 = vmatpush.msra.mxu2 %v768_v44  ;;  %815 = vmatpush.msra.mxu0 %v772_v55  ;;  %v1003_v44 = vld [vmem:[%s2095_s22 + $0x18] sm:$0xff] }
 0x112   : > { %838 = vmatpush.msra.mxu1 %v764_v46 }
 0x113   : > { %858 = vmatpush.msra.mxu2 %v765_v47  ;;  %816 = vmatpush.msra.mxu0 %v769_v56  ;;  %v1000_v56 = vld [vmem:[%s2095_s22] sm:$0xff] }
 0x114   : > { %839 = vmatpush.msra.mxu1 %v761_v49  ;;  %v1002_v49 = vld [vmem:[%s2095_s22 + $0x10] sm:$0xff] }
 0x115   : > { %859 = vmatpush.msra.mxu2 %v762_v50  ;;  %817 = vmatpush.msra.mxu0 %v766_v57 }
 0x116   : > { %840 = vmatpush.msra.mxu1 %v758_v52 }
 0x117   : > { %860 = vmatpush.msra.mxu2 %v759_v53  ;;  %841 = vmatmul.f32.vlgmr.msra.gmra.mxu1 %v2196_v54 }
 0x118   : > { %861 = vmatmul.f32.vlgmr.msra.gmra.mxu2 %v2196_v54  ;;  %818 = vmatpush.msra.mxu0 %v763_v58 }
 0x11a   : > { %819 = vmatpush.msra.mxu0 %v760_v59 }
 0x11c   : > { %820 = vmatpush.msra.mxu0 %v757_v60 }
 0x11d   : > { %821 = vmatmul.f32.vlgmr.msra.gmra.mxu0 %v2196_v54 }
 0x194   : > { %v842_v0 = vpop.f32.mrf.mxu1 }
 0x195   : > { %v884_v2 = vmul.f32 1.442695, %v842_v0 }
 0x197   : > { %1554 = vpow2.f32 %v884_v2 }
 0x198   : > { %1556 = vpow2.f32 %v889_v1 }
 0x19a   : > { %v822_v7 = vpop.f32.mrf.mxu0 }
 0x19b   : > { %v862_v3 = vpop.f32.mrf.mxu2  ;;  %v1390_v8 = vmul.f32 -1.442695, %v822_v7 }
 0x19d   : > { %v1555_v4 = vpop.eup %1554  ;;  %1558 = vpow2.f32 %v1390_v8 }
 0x19e   : > { %v1557_v5 = vpop.eup %1556  ;;  %v891_v6 = vmul.f32 %v1555_v4, %v862_v3 }
 0x1a0   : > { %911 = vmatpush.msra.mxu3 %v891_v6 }
 0x1a1   : > { %1391 = vmatmul.msk.f32.vlgmr.msra.gmra.mxu3 %vm892_vm0, %v1557_v5 }
 0x1a2   : > { %931 = vmatpush.msrb.mxu3 %v1555_v4 }
 0x1a3   : > { %v1559_v9 = vpop.eup %1558 }
 0x1a4   : > { %v868_v10 = vadd.f32 1.0, %v1559_v9  ;;  %1020 = vmatpush.msra.mxu3 %v1015_v12  ;;  %v1055_v12 = vld [vmem:[%s2097_s24 + $0x70] sm:$0xff] }
 0x1a6   : > { %1560 = vrcp.f32 %v868_v10  ;;  %1021 = vmatpush.msra.mxu3 %v1014_v13  ;;  %vm874_vm1 = vweird.f32 %v868_v10  ;;  %v880_v35 = vand.u32 2147483648, %v868_v10  ;;  %v878_v38 = vand.u32 2147483647, %v868_v10 }
 0x1a8   : > { %1022 = vmatpush.msra.mxu3 %v1013_v14  ;;  %v881_v45 = vor.u32 1.1754944e-38, %v880_v35  ;;  %vm879_vm8 = vcmp.eq.f32.partialorder %v878_v38, 8.507059e+37  ;;  %v1054_v14 = vld [vmem:[%s2097_s24 + $0x68] sm:$0xff] }
 0x1a9   : > { %1392 = vmatmul.msk.f32.vlgmr.msrb.gmra.mxu3 %vm892_vm0, %v1557_v5 }
 0x1aa   : > { %1023 = vmatpush.msra.mxu3 %v1012_v15 }
 0x1ac   : > { %v1561_v16 = vpop.eup %1560  ;;  %1024 = vmatpush.msra.mxu3 %v1011_v18  ;;  %v1052_v18 = vld [vmem:[%s2097_s24 + $0x58] sm:$0xff] }
 0x1ad   : > { %v870_v19 = vmul.f32 %v1561_v16, %v868_v10  ;;  %vm875_vm2 = vweird.f32 %v1561_v16 }
 0x1ae   : > { %1025 = vmatpush.msra.mxu3 %v1010_v20  ;;  %vm2220_vm4 = vmor %vm874_vm1, %vm875_vm2  ;;  %v1050_v20 = vld [vmem:[%s2097_s24 + $0x48] sm:$0xff] }
 0x1af   : > { %v871_v22 = vsub.f32 1.0, %v870_v19  ;;  %v1051_v19 = vld [vmem:[%s2097_s24 + $0x50] sm:$0xff] }
 0x1b0   : > { %1026 = vmatpush.msra.mxu3 %v1009_v21  ;;  %v1049_v21 = vld [vmem:[%s2097_s24 + $0x40] sm:$0xff] }
 0x1b1   : > { %v872_v27 = vmul.f32 %v1561_v16, %v871_v22 }
 0x1b2   : > { %1027 = vmatpush.msra.mxu3 %v1008_v23  ;;  %v1048_v23 = vld [vmem:[%s2097_s24 + $0x38] sm:$0xff] }
 0x1b3   : > { %v873_v36 = vadd.f32 %v1561_v16, %v872_v27  ;;  %v1046_v27 = vld [vmem:[%s2097_s24 + $0x28] sm:$0xff] }
 0x1b4   : > { %1028 = vmatpush.msra.mxu3 %v1007_v26 }
 0x1b5   : > { %v877_v47 = vsel %vm2220_vm4, %v1561_v16, %v873_v36  ;;  %v1053_v16 = vld [vmem:[%s2097_s24 + $0x60] sm:$0xff]  ;;  %v1549_v36 = vld [vmem:[%s715_s11] ss:$0 sm:$0xff] }
 0x1b6   : > { %1029 = vmatpush.msra.mxu3 %v1006_v29  ;;  %v882_v52 = vsel %vm879_vm8, %v881_v45, %v877_v47  ;;  %v1045_v29 = vld [vmem:[%s2097_s24 + $0x20] sm:$0xff] }
 0x1b8   : > { %1030 = vmatpush.msra.mxu3 %v1005_v34 }
 0x1ba   : > { %1031 = vmatpush.msra.mxu3 %v1004_v40  ;;  %v1042_v40 = vld [vmem:[%s2097_s24 + $0x8] sm:$0xff] }
 0x1bc   : > { %1032 = vmatpush.msra.mxu3 %v1003_v44 }
 0x1be   : > { %1033 = vmatpush.msra.mxu3 %v1002_v49 }
 0x1c0   : > { %1034 = vmatpush.msra.mxu3 %v1001_v51 }
 0x1c2   : > { %1035 = vmatpush.msra.mxu3 %v1000_v56 }
 0x224   : > { %v913_v11 = vpop.f32.mrf.mxu3 }
 0x22c   : > { %v933_v17 = vpop.f32.mrf.mxu3 }
 0x22d   : > { %1562 = vrcp.f32 %v933_v17  ;;  %v947_v31 = vand.u32 2147483648, %v933_v17  ;;  %v945_v33 = vand.u32 2147483647, %v933_v17  ;;  %vm941_vm5 = vweird.f32 %v933_v17 }
 0x22e   : > { %1564 = vrcp.f32 %v1849_v30 }
 0x22f   : > { %v948_v41 = vor.u32 1.1754944e-38, %v947_v31  ;;  %vm946_vm7 = vcmp.eq.f32.partialorder %v945_v33, 8.507059e+37  ;;  %v1044_v31 = vld [vmem:[%s2097_s24 + $0x18] sm:$0xff]  ;;  %v1548_v33 = vld [vmem:[%s712_s4] ss:$0 sm:$0xff] }
 0x233   : > { %v1563_v24 = vpop.eup %1562 }
 0x234   : > { %v937_v25 = vmul.f32 %v1563_v24, %v933_v17  ;;  %vm942_vm3 = vweird.f32 %v1563_v24  ;;  %v1565_v42 = vpop.eup %1564 }
 0x235   : > { %vm943_vm6 = vmor %vm941_vm5, %vm942_vm3  ;;  %v964_v50 = vmul.f32 8.0, %v1565_v42  ;;  %vm968_vm10 = vweird.f32 %v1565_v42 }
 0x236   : > { %v938_v28 = vsub.f32 1.0, %v937_v25  ;;  %v1047_v25 = vld [vmem:[%s2097_s24 + $0x30] sm:$0xff] }
 0x237   : > { %v965_v57 = vsub.f32 1.0, %v964_v50 }
 0x238   : > { %v939_v32 = vmul.f32 %v1563_v24, %v938_v28 }
 0x239   : > { %v966_v60 = vmul.f32 %v1565_v42, %v965_v57 }
 0x23a   : > { %v940_v39 = vadd.f32 %v1563_v24, %v939_v32 }
 0x23b   : > { %v967_v63 = vadd.f32 %v1565_v42, %v966_v60 }
 0x23c   : > { %v944_v43 = vsel %vm943_vm6, %v1563_v24, %v940_v39  ;;  %v1043_v39 = vld [vmem:[%s2097_s24 + $0x10] sm:$0xff] }
 0x23d   : > { %v949_v46 = vsel %vm946_vm7, %v948_v41, %v944_v43  ;;  %v2232_v2 = vsel %vm968_vm10, %v1565_v42, %v967_v63  ;;  %v1041_v41 = vld [vmem:[%s2097_s24] sm:$0xff]  ;;  %v1550_v42 = vld [vmem:[%s718_s21] ss:$0 sm:$0xff] }
 0x23e   : > { %v950_v48 = vmul.f32 %v949_v46, %v913_v11  ;;  %v1056_v11 = vld [vmem:[%s2097_s24 + $0x78] sm:$0xff]  ;;  %v1551_v46 = vld [vmem:[%s721_s1] ss:$0 sm:$0xff] }
 0x23f   : > { %1061 = vmatpush.msrb.mxu0 %v1056_v11 }
 0x240   : > { %vm951_vm9 = vcmp.ne.f32.partialorder %v950_v48, %v950_v48 }
 0x241   : > { %v952_v53 = vsel %vm951_vm9, 0.0, %v950_v48  ;;  %1062 = vmatpush.msrb.mxu0 %v1055_v12 }
 0x242   : > { %v953_v55 = vmul.f32 %v952_v53, %v882_v52 }
 0x243   : > { %1063 = vmatpush.msrb.mxu0 %v1054_v14 }
 0x244   : > { %v954_v58 = vadd.f32 %v953_v55, %v2196_v54 }
 0x245   : > { %1064 = vmatpush.msrb.mxu0 %v1053_v16 }
 0x246   : > { %v957_v59 = vrot.slane %v954_v58, 4 }
 0x247   : > { %1065 = vmatpush.msrb.mxu0 %v1052_v18 }
 0x248   : > { %v958_v61 = vadd.f32 %v957_v59, %v954_v58 }
 0x249   : > { %1066 = vmatpush.msrb.mxu0 %v1051_v19 }
 0x24a   : > { %v959_v62 = vrot.slane %v958_v61, 2 }
 0x24b   : > { %1067 = vmatpush.msrb.mxu0 %v1050_v20 }
 0x24c   : > { %v960_v0 = vadd.f32 %v959_v62, %v958_v61 }
 0x24d   : > { %1068 = vmatpush.msrb.mxu0 %v1049_v21 }
 0x24e   : > { %v961_v1 = vrot.slane %v960_v0, 1 }
 0x24f   : > { %1069 = vmatpush.msrb.mxu0 %v1048_v23 }
 0x250   : > { %v962_v3 = vadd.f32 %v961_v1, %v960_v0 }
 0x251   : > { %1070 = vmatpush.msrb.mxu0 %v1047_v25 }
 0x252   : > { %v970_v4 = vmul.f32 %v2232_v2, %v962_v3 }
 0x253   : > { %1071 = vmatpush.msrb.mxu0 %v1046_v27 }
 0x254   : > { %v971_v5 = vsub.f32 %v954_v58, %v970_v4 }
 0x255   : > { %1072 = vmatpush.msrb.mxu0 %v1045_v29 }
 0x256   : > { %v972_v54 = vmul.f32 %v971_v5, %v971_v5 }
 0x257   : > { %1073 = vmatpush.msrb.mxu0 %v1044_v31 }
 0x258   : > { %v973_v6 = vrot.slane %v972_v54, 4 }
 0x259   : > { %1074 = vmatpush.msrb.mxu0 %v1043_v39 }
 0x25a   : > { %v974_v7 = vadd.f32 %v973_v6, %v972_v54 }
 0x25b   : > { %1075 = vmatpush.msrb.mxu0 %v1042_v40 }
 0x25c   : > { %v975_v8 = vrot.slane %v974_v7, 2 }
 0x25d   : > { %1076 = vmatpush.msrb.mxu0 %v1041_v41 }
 0x25e   : > { %v976_v9 = vadd.f32 %v975_v8, %v974_v7 }
 0x260   : > { %v977_v10 = vrot.slane %v976_v9, 1 }
 0x262   : > { %v978_v13 = vadd.f32 %v977_v10, %v976_v9  ;;  %v1552_v10 = vld [vmem:[%s724_s2] ss:$0 sm:$0xff] }
 0x264   : > { %v979_v15 = vmul.f32 %v978_v13, %v2232_v2 }
 0x266   : > { %v980_v17 = vadd.f32 1e-05, %v979_v15 }
 0x268   : > { %1566 = vrsqrt.f32 %v980_v17  ;;  %vm987_vm12 = vweird.f32 %v980_v17 }
 0x26e   : > { %v1567_v22 = vpop.eup %1566 }
 0x26f   : > { %v982_v24 = vmul.f32 %v1567_v22, %v980_v17  ;;  %vm988_vm11 = vweird.f32 %v1567_v22 }
 0x270   : > { %vm989_vm13 = vmor %vm987_vm12, %vm988_vm11 }
 0x271   : > { %v983_v26 = vmul.f32 %v1567_v22, %v982_v24 }
 0x273   : > { %v984_v28 = vmul.f32 0.5, %v983_v26 }
 0x275   : > { %v985_v30 = vsub.f32 1.5, %v984_v28 }
 0x277   : > { %v986_v32 = vmul.f32 %v1567_v22, %v985_v30 }
 0x279   : > { %v990_v34 = vsel %vm989_vm13, %v1567_v22, %v986_v32 }
 0x27a   : > { %v991_v35 = vmul.f32 %v990_v34, %v971_v5 }
 0x27c   : > { %v995_v37 = vmul.f32 %v1548_v33, %v991_v35 }
 0x27e   : > { %v999_v38 = vadd.f32 %v1549_v36, %v995_v37 }
 0x280   : > { %1036 = vmatmul.f32.vlgmr.msra.gmra.mxu3 %v999_v38 }
 0x303   : > { %v1037_v43 = vpop.f32.mrf.mxu3 }
 0x304   : > { %v1038_v44 = vadd.f32 %v1550_v42, %v1037_v43 }
 0x306   : > { %v1040_v45 = vmax.f32 %v1038_v44, 0.0 }
 0x308   : > { %1077 = vmatmul.f32.vlgmr.msrb.gmra.mxu0 %v1040_v45 }
 0x385   : > { %v1078_v47 = vpop.f32.mrf.mxu0 }
 0x386   : > { %v1079_v48 = vadd.f32 %v1551_v46, %v1078_v47 }
 0x388   : > { %v1081_v49 = vadd.f32 %v1079_v48, %v999_v38 }
 0x38a   : > { %v1084_v50 = vrot.slane %v1081_v49, 4 }
 0x38c   : > { %v1085_v51 = vadd.f32 %v1084_v50, %v1081_v49 }
 0x38e   : > { %v1086_v52 = vrot.slane %v1085_v51, 2 }
 0x390   : > { %v1087_v53 = vadd.f32 %v1086_v52, %v1085_v51 }
 0x392   : > { %v1088_v55 = vrot.slane %v1087_v53, 1 }
 0x394   : > { %v1089_v56 = vadd.f32 %v1088_v55, %v1087_v53 }
 0x396   : > { %v1090_v57 = vmul.f32 %v1089_v56, %v2232_v2 }
 0x398   : > { %v1091_v58 = vsub.f32 %v1081_v49, %v1090_v57 }
 0x39a   : > { %v1092_v59 = vmul.f32 %v1091_v58, %v1091_v58 }
 0x39c   : > { %v1093_v60 = vrot.slane %v1092_v59, 4 }
 0x39e   : > { %v1094_v61 = vadd.f32 %v1093_v60, %v1092_v59 }
 0x3a0   : > { %v1095_v62 = vrot.slane %v1094_v61, 2 }
 0x3a2   : > { %v1096_v63 = vadd.f32 %v1095_v62, %v1094_v61 }
 0x3a4   : > { %v1097_v0 = vrot.slane %v1096_v63, 1 }
 0x3a6   : > { %v1098_v1 = vadd.f32 %v1097_v0, %v1096_v63 }
 0x3a8   : > { %v1099_v3 = vmul.f32 %v1098_v1, %v2232_v2  ;;  %v1553_v2 = vld [vmem:[%s727_s0] ss:$0 sm:$0xff] }
 0x3aa   : > { %v1100_v4 = vadd.f32 1e-05, %v1099_v3 }
 0x3ac   : > { %1568 = vrsqrt.f32 %v1100_v4  ;;  %vm1107_vm15 = vweird.f32 %v1100_v4 }
 0x3b2   : > { %v1569_v5 = vpop.eup %1568 }
 0x3b3   : > { %v1102_v54 = vmul.f32 %v1569_v5, %v1100_v4  ;;  %vm1108_vm14 = vweird.f32 %v1569_v5 }
 0x3b4   : > { %vm1109_vm0 = vmor %vm1107_vm15, %vm1108_vm14 }
 0x3b5   : > { %v1103_v6 = vmul.f32 %v1569_v5, %v1102_v54 }
 0x3b7   : > { %v1104_v7 = vmul.f32 0.5, %v1103_v6 }
 0x3b9   : > { %v1105_v8 = vsub.f32 1.5, %v1104_v7 }
 0x3bb   : > { %v1106_v9 = vmul.f32 %v1569_v5, %v1105_v8 }
 0x3bd   : > { %v1110_v11 = vsel %vm1109_vm0, %v1569_v5, %v1106_v9 }
 0x3be   : > { %v1111_v12 = vmul.f32 %v1110_v11, %v1091_v58 }
 0x3c0   : > { %v1115_v13 = vmul.f32 %v1552_v10, %v1111_v12  ;;  %1124 = sbr.rel (%p1393_p12) target bundleno = 966 (0x3c6), region = 104 }
 0x3c2   : > { %v1119_v14 = vadd.f32 %v1553_v2, %v1115_v13 }
 0x3c4   : > { %1120 = vst [vmem:[#allocation2] sm:$0xff] %v1119_v14 }
 0x3c5   : > { %1125 = vst [vmem:[%s701_s3] sm:$0xff] %v1119_v14 }
 0x3c6 PF: > { %s2431_s2 = sld [smem:[#allocation20_spill]]  ;;  %s1395_s17 = sshll.u32 %s1827_s20, 3 }
 0x3c7   : > { %s2433_s30 = sld [smem:[#allocation47_spill]]  ;;  %s1139_s0 = sshll.u32 %s701_s3, 4  ;;  %s1140_s0 = int_to_ptr.vmem [resolvable:$true] %s1139_s0 }
 0x3cc   : > { %s2435_s19 = sand.u32 1, %s2431_s2  }
 0x3cd   : > { %s2434_s5 = smov %s2433_s30  ;;  %s1137_s18 = scalar_lea.hbm %s2433_s30, %s1395_s17 }
 0x3ce   : > { %s1141_s29 = sshll.u32 %s1137_s18, 4  ;;  %s1127_s22 = scalar_lea.sflag [#allocation5], %s2435_s19  ;;  %s1142_s29 = int_to_ptr.hbm [resolvable:$true] %s1141_s29 }
 0x3cf   : > { %s1719_s28 = sshra.s32 %s1142_s29, 4  ;;  %s1725_s12 = scalar_lea.hbm %s2434_s5, 16  ;;  %s1720_s28 = int_to_ptr.hbm [resolvable:$true] %s1719_s28 }
 0x3d0   : > { %s1721_s23 = scalar_lea.hbm %s1720_s28, 8  ;;  %p1726_p2 = scmp.lt.s32.totalorder %s1720_s28, %s2434_s5 }
 0x3d1   : > { %p1722_p13 = scmp.ne.s32.totalorder %s1720_s28, %s1721_s23  ;;  %p1727_p4 = scmp.lt.s32.totalorder %s1725_s12, %s1721_s23 }
 0x3d3   : > { %p1723_p0 = pnand %p1722_p13, %p2040_p3  ;;  %p1728_p6 = por %p1727_p4, %p1726_p2 }
 0x3d5   : > { %p1724_p1 = pneg %p1723_p0 }
 0x3d7   : > { %p1729_p8 = pnand %p1728_p6, %p1724_p1 }
 0x3d9   : > { %1732 = shalt.err (!%p1729_p8)
}
 0x3da   : > { %1417 = dma.vmem_to_hbm [thread:$0]  (%p2040_p3), %s1140_s0, 128, %s1142_s29, %s1127_s22  }
 0x3db PF: > { %s2436_s9 = sld [smem:[#allocation26_spill]] }
 0x3dc   : > { %s2437_s3 = sld [smem:[#allocation19_spill]] }
 0x3e1   : > { %p1445_p10 = scmp.ge.s32.totalorder %s2436_s9, 2 }
 0x3e2   : > { %s1153_s11 = sand.u32 1, %s2437_s3  }
 0x3e3   : > { %p1437_p7 = pnand %p1445_p10, %p2045_p5  ;;  %s1154_s14 = scalar_lea.sflag [#allocation5], %s1153_s11 }
 0x3e5   : > { %p1438_p9 = pneg %p1437_p7 }
 0x3e7   : > { %1794 = dma.done.wait (%p1438_p9), %s1154_s14, 128  }
 0x3e8   : > { %1796 = vsyncadd (%p1438_p9), %s1154_s14, 4294967168  ;;  %s35_s23 = sadd.s32 1, %s2436_s9   ;;  %s2439_s29 = sld [smem:[#allocation20_spill]] }
 0x3e9   : > { %p32_p11 = scmp.ge.s32.totalorder %s35_s23, 6   ;;  %s2440_s30 = sld [smem:[#allocation21_spill]] }
 0x3ea   : > { %s2441_s15 = sld [smem:[#allocation30_spill]] }
 0x3eb   : > { %s2442_s16 = sld [smem:[#allocation22_spill]] }
 0x3ec   : > { %s2443_s17 = sld [smem:[#allocation23_spill]] }
 0x3ed   : > { %s2444_s18 = sld [smem:[#allocation29_spill]]  ;;  %34 = sbr.rel (!%p32_p11) target bundleno = 29 (0x1d), region = 187 }
 0x3ee   : > { %s2445_s19 = sld [smem:[#allocation24_spill]] }
 0x3ef   : > { %s2446_s20 = sld [smem:[#allocation25_spill]] }
 0x3f0   : > { %s2447_s21 = sld [smem:[#allocation27_spill]] }
 0x3f1   : > { %s2448_s22 = sld [smem:[#allocation28_spill]] }
 0x3f2   :  { %1160 = vsyncpa [#allocation4], 1 }
 0x3f3   :  { %1162 = vsyncpa [#allocation4 + $0x1], 1 }
 0x3f4   :  { %1163 = vsyncpa [#allocation9], 1 }
 0x3f5   :  { %1165 = vsyncpa [#allocation9 + $0x1], 1 }
 0x3f6   :  { %1166 = vsyncpa [#allocation12], 1 }
 0x3f7   :  { %1168 = vsyncpa [#allocation12 + $0x1], 1 }
 0x3f8   :  { %1169 = vsyncpa [#allocation5], 1 }
 0x3f9   :  { %1171 = vsyncpa [#allocation5 + $0x1], 1 }
 0x3fa   :  { %1172 = vsyncpa [#allocation6], 1 }
 0x3fb   :  { %1174 = vsyncpa [#allocation6 + $0x1], 1 }

</bundles_post_ra>
